<compile_context>
chip_gen: v6e
topology: v6e:2x2x1
jax: 0.10.0
libtpu: 0.0.40
codegen_flags: <defaults>
</compile_context>

<pallas_src>
import math

import jax
import jax.numpy as jnp
from jax.experimental import pallas as pl
from jax.experimental.pallas import tpu as pltpu

N_EMBD = 64
BLOCK_SIZE = 32   # max sequence length supported by the causal mask (same as gpt.py)

_NEG_INF = -1e30  # finite "minus infinity": robust even if a row were ever fully masked


def _head_kernel(x_ref, w_ref, o_ref):
    # x_ref: (Bt, T, C) batch tile (f32); w_ref: (C, 3H) fused bf16 [Wk | Wq*scale | Wv];
    # o_ref: (Bt, T, H).
    Bt, T, C = x_ref.shape
    H = w_ref.shape[1] // 3

    # bf16 MXU inputs, f32 accumulation. x is cast in-kernel (cheap VPU op) so the HBM
    # side stays a single f32 read instead of an extra host-side rewrite of x.
    x = x_ref[...].astype(jnp.bfloat16).reshape(Bt * T, C)
    w = w_ref[...]

    # One tall projection matmul on the MXU: (Bt*T, C) @ (C, 3H) -> f32.
    qkv = jnp.dot(x, w, preferred_element_type=jnp.float32).reshape(Bt, T, 3 * H)
    k = qkv[:, :, 0:H]
    q = qkv[:, :, H:2 * H]          # 1/sqrt(n_embd) scale already folded into Wq
    v = qkv[:, :, 2 * H:3 * H]

    # Scores: contract the H axes directly (no explicit transpose of k).
    # TODO(synk): confirm in the Mosaic dump that this einsum does not materialize a
    # per-step transposed copy of k; if it does, emit k pre-transposed from the projection.
    s = jnp.einsum('bqd,bkd->bqk', q.astype(jnp.bfloat16), k.astype(jnp.bfloat16),
                   preferred_element_type=jnp.float32)           # (Bt, T, T) f32

    # Causal mask (tril): position i attends to j <= i.
    row = jax.lax.broadcasted_iota(jnp.int32, (T, T), 0)
    col = jax.lax.broadcasted_iota(jnp.int32, (T, T), 1)
    s = jnp.where((col <= row)[None, :, :], s, jnp.float32(_NEG_INF))

    # Numerically stable softmax over keys; normalize AFTER the PV matmul so the VPU
    # multiply touches the (Bt,T,H) tensor, not the (Bt,T,T) one. The reciprocal runs
    # on the EUP (separate slot, effectively free).
    m = jnp.max(s, axis=-1, keepdims=True)
    e = jnp.exp(s - m)                                           # (Bt, T, T) f32
    denom = jnp.sum(e, axis=-1, keepdims=True)                   # (Bt, T, 1)

    out = jnp.einsum('bqk,bkd->bqd', e.astype(jnp.bfloat16), v.astype(jnp.bfloat16),
                     preferred_element_type=jnp.float32)         # (Bt, T, H) f32
    out = out * pl.reciprocal(denom, approx=True)
    o_ref[...] = out.astype(o_ref.dtype)


def _num_tensorcores():
    """Best-effort TensorCores-per-chip detection: 1 on v5e/v6e, 2 on v7x (megacore)."""
    try:
        info = pltpu.get_tpu_info()
        for attr in ("num_tensorcores", "tensorcores_per_chip", "num_cores",
                     "cores_per_chip", "core_count"):
            n = getattr(info, attr, None)
            if isinstance(n, int) and n >= 1:
                return n
    except Exception:
        pass
    try:
        kind = jax.devices()[0].device_kind.lower()
        if "v7" in kind:
            return 2
    except Exception:
        pass
    return 1  # v5e / v6e: one TensorCore per chip


def _choose_batch_tile(B, T, num_tc, target_rows=2048):
    """Pick Bt so Bt*T ~ target_rows flattened rows (>= 512 KiB x tiles) so DMA size and
    per-step compute dominate the ~0.35us/step grid overhead. On single-TC chips
    (v5e/v6e) the whole batch becomes one tile when it fits the row target; on v7x the
    parallel batch axis is split into (near-)equal halves so both TensorCores get
    balanced work (ragged remainder handled by masked stores, not padding)."""
    bt = max(1, target_rows // max(T, 1))
    bt = min(bt, B)
    if num_tc > 1 and B > 1:
        bt = min(bt, pl.cdiv(B, num_tc))
    return max(1, bt)


def head_forward(x, wk, wq, wv, *, batch_tile=None):
    """x: (B, T, C); wk/wq/wv: (C, H) (nn.Linear(C, H, bias=False) stored transposed).
    Returns (B, T, H)."""
    B, T, C = x.shape
    H = wk.shape[1]
    assert T <= BLOCK_SIZE and C == N_EMBD
    assert wk.shape == (C, H) and wq.shape == (C, H) and wv.shape == (C, H)

    # Fuse the three projection weights (one weight DMA / one MXU weight push) and fold
    # the reference's 1/sqrt(C) = 1/sqrt(n_embd) scale into Wq (exactly 1/8, lossless).
    # NOTE: parity with the PyTorch module, which scales by sqrt(n_embd), NOT sqrt(head_size).
    scale = 1.0 / math.sqrt(C)
    w_qkv = jnp.concatenate([wk, wq * scale, wv], axis=1).astype(jnp.bfloat16)  # (C, 3H)

    bt = (min(batch_tile, B) if batch_tile is not None
          else _choose_batch_tile(B, T, _num_tensorcores()))
    # Ragged final block (when bt does not divide B) is handled by Pallas' masked
    # boundary stores -- no host-side jnp.pad of x and no out[:B] slice copy.
    n_blocks = pl.cdiv(B, bt)

    out = pl.pallas_call(
        _head_kernel,
        out_shape=jax.ShapeDtypeStruct((B, T, H), x.dtype),
        grid_spec=pltpu.PrefetchScalarGridSpec(
            num_scalar_prefetch=0,
            grid=(n_blocks,),
            in_specs=[
                pl.BlockSpec((bt, T, C), lambda b: (b, 0, 0)),   # x batch tile
                pl.BlockSpec((C, 3 * H), lambda b: (0, 0)),      # fused W_qkv (resident)
            ],
            out_specs=pl.BlockSpec((bt, T, H), lambda b: (b, 0, 0)),
        ),
        compiler_params=pltpu.CompilerParams(
            dimension_semantics=("parallel",),
            # Even ~2048-row x tiles double-buffered are a few MiB; 32 MiB is inside the
            # scoped-VMEM default on every generation (incl. v7x's 64 MiB physical) and
            # leaves pipeline headroom. VMEM capacity is not the binding resource here.
            vmem_limit_bytes=32 * 1024 * 1024,
        ),
    )(x, w_qkv)

    # TODO(synk): a single head's output is only H=16 lanes wide (masked partial stores)
    # and the projection matmul has N=48, K=64 -- fusing the model's n_heads (and the
    # output projection) into one kernel would make both lane-dense, but that changes
    # the single-`Head` module interface, so it is out of scope here.
    return out


def _reference(x, wk, wq, wv):
    # Pure-JAX (f32) reference mirroring the PyTorch forward.
    B, T, C = x.shape
    k = x @ wk
    q = x @ wq
    v = x @ wv
    wgt = q @ jnp.swapaxes(k, -2, -1) / math.sqrt(C)
    mask = jnp.tril(jnp.ones((T, T), dtype=bool))
    wgt = jnp.where(mask, wgt, -jnp.inf)
    wgt = jax.nn.softmax(wgt, axis=-1)
    return wgt @ v


if __name__ == "__main__":
    key = jax.random.PRNGKey(0)
    head_size = 16
    bound = 1.0 / math.sqrt(N_EMBD)  # nn.Linear-style U(-1/sqrt(C), 1/sqrt(C)) init

    kk, kq, kv, kx1, kx2 = jax.random.split(key, 5)
    wk = jax.random.uniform(kk, (N_EMBD, head_size), jnp.float32, -bound, bound)
    wq = jax.random.uniform(kq, (N_EMBD, head_size), jnp.float32, -bound, bound)
    wv = jax.random.uniform(kv, (N_EMBD, head_size), jnp.float32, -bound, bound)

    # bf16 MXU inputs (f32 accumulation) + approximate EUP reciprocal => compare against
    # the f32 reference with a slightly looser tolerance than pure-f32 would need.
    ATOL = RTOL = 2e-2

    # Case 1: small shape implied by the module (B=2, T=8, C=n_embd=64).
    x1 = jax.random.normal(kx1, (2, 8, N_EMBD), dtype=jnp.float32)
    out1 = jax.block_until_ready(head_forward(x1, wk, wq, wv))
    ref1 = _reference(x1, wk, wq, wv)
    assert out1.shape == (2, 8, head_size)
    assert jnp.allclose(out1, ref1, atol=ATOL, rtol=RTOL), "mismatch vs reference (case 1)"

    # Case 2: full block_size sequence (B=5, T=32). On 1-TC chips this is a single grid
    # step; on v7x it splits into two balanced batch tiles (3 + 2, ragged block masked).
    x2 = jax.random.normal(kx2, (5, BLOCK_SIZE, N_EMBD), dtype=jnp.float32)
    out2 = jax.block_until_ready(head_forward(x2, wk, wq, wv))
    ref2 = _reference(x2, wk, wq, wv)
    assert out2.shape == (5, BLOCK_SIZE, head_size)
    assert jnp.allclose(out2, ref2, atol=ATOL, rtol=RTOL), "mismatch vs reference (case 2)"

    print("KERNEL_OK")
</pallas_src>

<mosaic_0001>
module attributes {stable_mosaic.version = 11 : i64} {
  func.func @_head_kernel(%arg0: i32, %arg1: memref<2x8x64xf32, #tpu.memory_space<vmem>>, %arg2: memref<64x48xbf16, #tpu.memory_space<vmem>>, %arg3: memref<2x8x16xf32, #tpu.memory_space<vmem>>) attributes {dimension_semantics = [#tpu.dimension_semantics<parallel>], iteration_bounds = array<i64: 1>, scalar_prefetch = 0 : i64, scratch_operands = 0 : i64, tpu.core_type = #tpu.core_type<tc>, window_params = [{transform_indices = @transform_0, window_bounds = array<i64: 2, 8, 64>}, {pipeline_mode = #tpu.pipeline_mode<synchronous>, transform_indices = @transform_1, window_bounds = array<i64: 64, 48>}, {transform_indices = @transform_2, window_bounds = array<i64: 2, 8, 16>}]} {
    %c0 = arith.constant 0 : index
    %c0_0 = arith.constant 0 : index
    %c0_1 = arith.constant 0 : index
    %0 = vector.load %arg1[%c0, %c0_0, %c0_1] : memref<2x8x64xf32, #tpu.memory_space<vmem>>, vector<2x8x64xf32>
    %1 = arith.truncf %0 : vector<2x8x64xf32> to vector<2x8x64xbf16>
    %2 = vector.shape_cast %1 : vector<2x8x64xbf16> to vector<16x64xbf16>
    %c0_2 = arith.constant 0 : index
    %c0_3 = arith.constant 0 : index
    %3 = vector.load %arg2[%c0_2, %c0_3] : memref<64x48xbf16, #tpu.memory_space<vmem>>, vector<64x48xbf16>
    %cst = arith.constant dense<0.000000e+00> : vector<16x48xf32>
    %4 = tpu.matmul %2, %3, %cst {dimension_numbers = #tpu.dot_dimension_numbers<[1], [0], [0], [1], [0, 0, 1, 1], [], []>} : vector<16x64xbf16>, vector<64x48xbf16>, vector<16x48xf32> -> vector<16x48xf32>
    %5 = vector.shape_cast %4 : vector<16x48xf32> to vector<2x8x48xf32>
    %6 = vector.extract_strided_slice %5 {offsets = [0, 0, 0], sizes = [2, 8, 16], strides = [1, 1, 1]} : vector<2x8x48xf32> to vector<2x8x16xf32>
    %7 = vector.extract_strided_slice %5 {offsets = [0, 0, 16], sizes = [2, 8, 16], strides = [1, 1, 1]} : vector<2x8x48xf32> to vector<2x8x16xf32>
    %8 = vector.extract_strided_slice %5 {offsets = [0, 0, 32], sizes = [2, 8, 16], strides = [1, 1, 1]} : vector<2x8x48xf32> to vector<2x8x16xf32>
    %9 = arith.truncf %7 : vector<2x8x16xf32> to vector<2x8x16xbf16>
    %10 = arith.truncf %6 : vector<2x8x16xf32> to vector<2x8x16xbf16>
    "tpu.trace_start"() <{level = 10 : i32, message = "bqd,bkd->bqk"}> : () -> ()
    %cst_4 = arith.constant dense<0.000000e+00> : vector<2x8x8xf32>
    %11 = tpu.matmul %9, %10, %cst_4 {dimension_numbers = #tpu.dot_dimension_numbers<[2], [2], [1], [1], [0, 0, 0, 1, 1, 1], [0], [0]>} : vector<2x8x16xbf16>, vector<2x8x16xbf16>, vector<2x8x8xf32> -> vector<2x8x8xf32>
    "tpu.trace_stop"() : () -> ()
    %12 = tpu.iota {dimensions = array<i32: 0>} : vector<8x8xi32>
    %13 = tpu.iota {dimensions = array<i32: 1>} : vector<8x8xi32>
    %14 = arith.cmpi sle, %13, %12 : vector<8x8xi32>
    %15 = vector.shape_cast %14 : vector<8x8xi1> to vector<1x8x8xi1>
    %cst_5 = arith.constant -1.000000e+30 : f32
    %16 = vector.shape_cast %15 : vector<1x8x8xi1> to vector<1x8x8xi1>
    %17 = vector.broadcast %16 : vector<1x8x8xi1> to vector<2x8x8xi1>
    %18 = vector.broadcast %cst_5 : f32 to vector<2x8x8xf32>
    %19 = arith.select %17, %11, %18 : vector<2x8x8xi1>, vector<2x8x8xf32>
    %cst_6 = arith.constant dense<0xFF800000> : vector<2x8xf32>
    %20 = vector.multi_reduction <maximumf>, %19, %cst_6 [2] : vector<2x8x8xf32> to vector<2x8xf32>
    %21 = vector.shape_cast %20 : vector<2x8xf32> to vector<2x8x1xf32>
    %22 = vector.broadcast %21 : vector<2x8x1xf32> to vector<2x8x8xf32>
    %23 = arith.subf %19, %22 : vector<2x8x8xf32>
    %24 = math.exp %23 : vector<2x8x8xf32>
    %cst_7 = arith.constant dense<0.000000e+00> : vector<2x8xf32>
    %25 = vector.multi_reduction <add>, %24, %cst_7 [2] : vector<2x8x8xf32> to vector<2x8xf32>
    %26 = vector.shape_cast %25 : vector<2x8xf32> to vector<2x8x1xf32>
    %27 = arith.truncf %24 : vector<2x8x8xf32> to vector<2x8x8xbf16>
    %28 = arith.truncf %8 : vector<2x8x16xf32> to vector<2x8x16xbf16>
    "tpu.trace_start"() <{level = 10 : i32, message = "bqk,bkd->bqd"}> : () -> ()
    %cst_8 = arith.constant dense<0.000000e+00> : vector<2x8x16xf32>
    %29 = tpu.matmul %27, %28, %cst_8 {dimension_numbers = #tpu.dot_dimension_numbers<[2], [1], [1], [2], [0, 0, 0, 1, 1, 2], [0], [0]>} : vector<2x8x8xbf16>, vector<2x8x16xbf16>, vector<2x8x16xf32> -> vector<2x8x16xf32>
    "tpu.trace_stop"() : () -> ()
    %30 = tpu.reciprocal %26 {approx = true} : vector<2x8x1xf32> -> vector<2x8x1xf32>
    %31 = vector.broadcast %30 : vector<2x8x1xf32> to vector<2x8x16xf32>
    %32 = arith.mulf %29, %31 : vector<2x8x16xf32>
    %c0_9 = arith.constant 0 : index
    %c0_10 = arith.constant 0 : index
    %c0_11 = arith.constant 0 : index
    %33 = vector.load %arg3[%c0_9, %c0_10, %c0_11] : memref<2x8x16xf32, #tpu.memory_space<vmem>>, vector<2x8x16xf32>
    tpu.vector_store %arg3[%c0_9, %c0_10, %c0_11], %32 {strides = array<i32>} : memref<2x8x16xf32, #tpu.memory_space<vmem>>, vector<2x8x16xf32>,
    return
  }
  func.func @transform_0(%arg0: i32) -> (i32, i32, i32) {
    %c0_i32 = arith.constant 0 : i32
    %c0_i32_0 = arith.constant 0 : i32
    %c0_i32_1 = arith.constant 0 : i32
    return %arg0, %c0_i32, %c0_i32_0 : i32, i32, i32
  }
  func.func @transform_1(%arg0: i32) -> (i32, i32) {
    %c0_i32 = arith.constant 0 : i32
    %c0_i32_0 = arith.constant 0 : i32
    %c0_i32_1 = arith.constant 0 : i32
    return %c0_i32, %c0_i32_0 : i32, i32
  }
  func.func @transform_2(%arg0: i32) -> (i32, i32, i32) {
    %c0_i32 = arith.constant 0 : i32
    %c0_i32_0 = arith.constant 0 : i32
    %c0_i32_1 = arith.constant 0 : i32
    return %arg0, %c0_i32, %c0_i32_0 : i32, i32, i32
  }
}

</mosaic_0001>

<bundles_post_ra>
// kernel: tpu_custom_call.1
= control target key start
LH: loop header
LB: loop body
LE: loop exit
PB: predicated region body
PF: predicated region fallthrough
CT: control target
= control target key end

     0   :  { %v450_v1 = vmov 0.0   ;;  %vm451_vm0 = vmmov 0   ;;  %s514_s0 = inlined_call_operand.vmem [shape: f32[2,8,64], index: 0, kind: input, shape index: {}]   ;;  %s515_s1 = inlined_call_operand.vmem [shape: bf16[64,48], index: 1, kind: input, shape index: {}]   ;;  %s516_s2 = inlined_call_operand.hbm [shape: f32[2,8,16], index: 2, kind: output, shape index: {}]  }
   0x1   :  { %v416_v0 = vld [vmem:[%s515_s1 + $0x18] sm:$0xff]   ;;  %373 = vmatprep.subr.bf16.mxu0 %v450_v1  ;;  %385 = vmatprep.subr.bf16.mxu1 %v450_v1  ;;  %v417_v2 = vld [vmem:[%s515_s1 + $0x10] sm:$0xff]  }
   0x2   :  { %374 = vmatpush3.bf16.msra.mxu0 %v416_v0  ;;  %381 = vmatprep.mubr.msk.bf16.mxu0 %vm451_vm0, %v450_v1 }
   0x3   :  { %375 = vmatprep.subr.bf16.mxu0 %v450_v1  ;;  %387 = vmatprep.mubr.msk.bf16.mxu1 %vm451_vm0, %v450_v1 }
   0x4   :  { %7 = vsyncpa [#allocation3], 0  ;;  %v418_v3 = vld [vmem:[%s515_s1 + $0x8] sm:$0xff]   ;;  %v419_v4 = vld [vmem:[%s515_s1] sm:$0xff]   ;;  %vm54_vm1 = vcmask 523264   ;;  %vm104_vm2 = vcmask 130048   ;;  %v200_v20 = vlaneseq }
   0x5   :  { %v13_v5 = vld [vmem:[%s514_s0] sm:$0xff]  ;;  %v14_v6 = vld [vmem:[%s514_s0 + $0x8] sm:$0xff]  ;;  %s452_s1 = smov 112   ;;  %s453_s0 = smov 96   ;;  %vm235_vm3 = vcmask 1043456   ;;  %vm209_vm5 = vcmask 64512  }
   0x6   :  { %376 = vmatpush3.bf16.msra.mxu0 %v417_v2  ;;  %v359_v7 = vpack.c.bf16 %v14_v6, %v13_v5  ;;  %v201_v21 = vshrl.u32 %v200_v20, 7  ;;  %v203_v22 = vand.u32 127, %v200_v20  ;;  %s454_s21 = smov [#allocation2]  }
   0x7   :  { %377 = vmatprep.subr.bf16.mxu0 %v450_v1  ;;  %s338_s22 = sshll.u32 %s454_s21, 4  ;;  %s339_s22 = int_to_ptr.vmem [resolvable:$true] %s338_s22 }
   0x8   :  { %vm204_vm4 = vcmp.le.s32.totalorder %v203_v22, %v201_v21  ;;  %s428_s23 = scalar_lea.vmem %s339_s22, 256  ;;  %p433_p1 = scmp.lt.s32.totalorder %s339_s22, %s339_s22 }
   0x9   :  { %p429_p0 = scmp.ne.s32.totalorder %s339_s22, %s428_s23  ;;  %p434_p2 = scmp.lt.s32.totalorder %s428_s23, %s428_s23 }
   0xa   :  { %378 = vmatpush3.bf16.msra.mxu0 %v418_v3 }
   0xb   :  { %379 = vmatprep.subr.bf16.mxu0 %v450_v1  ;;  %p435_p3 = por %p434_p2, %p433_p1 }
   0xd   :  { %p436_p4 = pnand %p435_p3, %p429_p0 }
   0xe   :  { %380 = vmatpush3.bf16.msra.mxu0 %v419_v4 }
   0xf   :  { %397 = vmatprep.subr.bf16.mxu0 %v450_v1 }
  0x11   :  { %382 = vmatmul.mubr.msk.bf16.vlgmr.msra.gmra.mxu0 %vm54_vm1, %v359_v7 }
  0x12   :  { %399 = vmatprep.mubr.msk.bf16.mxu0 %vm451_vm0, %v450_v1 }
  0xd1   :  { %v92_v8 = vpop.f32.mrf.mxu0 }
  0xd2   :  { %v99_v9 = vpack.c.bf16 %v92_v8, %v92_v8 }
  0xd3   :  { %v383_v10 = vpop.f32.mrf.mxu0 }
  0xd4   :  { %102 = vrot.lane.b32.xlu0 %v99_v9, %s452_s1  ;;  %v109_v11 = vsel %vm104_vm2, %v99_v9, 0 }
  0xd5   :  { %v95_v12 = vpop.f32.mrf.mxu0  ;;  %386 = vmatpush3.bf16.xpose.msra.mxu1 %v109_v11 }
  0xd6   :  { %v100_v13 = vpack.c.bf16 %v95_v12, %v95_v12  ;;  %391 = vmatprep.subr.bf16.mxu1 %v450_v1 }
  0xd7   :  { %v384_v14 = vpop.f32.mrf.mxu0 }
  0xd8   :  { %152 = vrot.lane.b32.xlu0 %v100_v13, %s452_s1  ;;  %v158_v16 = vsel %vm104_vm2, %v100_v13, 0 }
  0xdc   :  { %230 = vrot.lane.b32.xlu0 %v99_v9, %s453_s0 }
 0x146   :  { %v103_v15 = vpop.permute.xlu0 %102 }
 0x147   :  { %388 = vmatmul.mubr.msk.bf16.vlgmr.msra.gmra.mxu1 %vm104_vm2, %v103_v15 }
 0x148   :  { %392 = vmatpush3.bf16.xpose.msra.mxu1 %v158_v16  ;;  %393 = vmatprep.mubr.msk.bf16.mxu1 %vm451_vm0, %v450_v1 }
 0x149   :  { %403 = vmatprep.subr.bf16.mxu1 %v450_v1 }
 0x14a   :  { %v153_v17 = vpop.permute.xlu0 %152 }
 0x14e   :  { %v231_v18 = vpop.permute.xlu0 %230 }
 0x14f   :  { %v237_v19 = vsel %vm235_vm3, %v231_v18, 0  ;;  %394 = vmatmul.mubr.msk.bf16.vlgmr.msra.gmra.mxu1 %vm104_vm2, %v153_v17 }
 0x150   :  { %398 = vmatpush3.bf16.msra.mxu0 %v237_v19  ;;  %405 = vmatprep.mubr.msk.bf16.mxu1 %vm451_vm0, %v450_v1 }
 0x207   :  { %v145_v23 = vpop.f32.mrf.mxu1 }
 0x208   :  { %v207_v24 = vsel %vm204_vm4, %v145_v23, -1e+30 }
 0x209   :  { %v389_v25 = vpop.f32.mrf.mxu1  ;;  %v210_v26 = vsel %vm209_vm5, %v207_v24, -inf }
 0x20a   :  { %211 = vmax.xlane.f32.xlu1 %v210_v26 }
 0x20b   :  { %v148_v27 = vpop.f32.mrf.mxu1 }
 0x20d   :  { %v390_v28 = vpop.f32.mrf.mxu1 }
 0x20f   :  { %v194_v29 = vpop.f32.mrf.mxu1 }
 0x210   :  { %v208_v30 = vsel %vm204_vm4, %v194_v29, -1e+30 }
 0x211   :  { %v395_v31 = vpop.f32.mrf.mxu1  ;;  %v213_v32 = vsel %vm209_vm5, %v208_v30, -inf }
 0x212   :  { %214 = vmax.xlane.f32.xlu1 %v213_v32 }
 0x213   :  { %v197_v33 = vpop.f32.mrf.mxu1 }
 0x215   :  { %v396_v34 = vpop.f32.mrf.mxu1 }
 0x223   :  { %279 = vrot.lane.b32.xlu1 %v100_v13, %s453_s0 }
 0x293   :  { %v212_v35 = vpop.xlane.xlu1 %211 }
 0x294   :  { %v216_v36 = vsub.f32 %v207_v24, %v212_v35 }
 0x296   :  { %v218_v37 = vmul.f32 1.442695, %v216_v36 }
 0x298   :  { %420 = vpow2.f32 %v218_v37 }
 0x29b   :  { %v215_v38 = vpop.xlane.xlu1 %214 }
 0x29c   :  { %v217_v39 = vsub.f32 %v208_v30, %v215_v38 }
 0x29e   :  { %v220_v40 = vmul.f32 1.442695, %v217_v39 }
 0x29f   :  { %v280_v41 = vpop.permute.xlu1 %279 }
 0x2a0   :  { %422 = vpow2.f32 %v220_v40  ;;  %v285_v42 = vsel %vm235_vm3, %v280_v41, 0 }
 0x2a1   :  { %404 = vmatpush3.bf16.msra.mxu1 %v285_v42 }
 0x2a5   :  { %v421_v43 = vpop.eup %420 }
 0x2a6   :  { %v222_v44 = vsel %vm209_vm5, %v421_v43, 0.0  ;;  %v228_v45 = vpack.c.bf16 %v421_v43, %v421_v43 }
 0x2a7   :  { %223 = vadd.xlane.f32.xlu0 %v222_v44 }
 0x2a8   :  { %400 = vmatmul.mubr.msk.bf16.vlgmr.msra.gmra.mxu0 %vm209_vm5, %v228_v45 }
 0x2ad   :  { %v423_v46 = vpop.eup %422 }
 0x2ae   :  { %v225_v47 = vsel %vm209_vm5, %v423_v46, 0.0  ;;  %v229_v48 = vpack.c.bf16 %v423_v46, %v423_v46 }
 0x2af   :  { %226 = vadd.xlane.f32.xlu1 %v225_v47 }
 0x2b0   :  { %406 = vmatmul.mubr.msk.bf16.vlgmr.msra.gmra.mxu1 %vm209_vm5, %v229_v48 }
 0x330   :  { %v224_v49 = vpop.xlane.xlu0 %223 }
 0x331   :  { %424 = vrcp.f32 %v224_v49 }
 0x338   :  { %v227_v50 = vpop.xlane.xlu1 %226 }
 0x339   :  { %426 = vrcp.f32 %v227_v50 }
 0x33e   :  { %v425_v51 = vpop.eup %424 }
 0x346   :  { %v427_v57 = vpop.eup %426 }
 0x368   :  { %v273_v52 = vpop.f32.mrf.mxu0 }
 0x369   :  { %v329_v53 = vmul.f32 %v425_v51, %v273_v52 }
 0x36a   :  { %v401_v54 = vpop.f32.mrf.mxu0 }
 0x36b   :  { %331 = vst.msk [vmem:[#allocation2] sm:$0xff] %vm104_vm2, %v329_v53 }
 0x36c   :  { %v276_v55 = vpop.f32.mrf.mxu0 }
 0x36e   :  { %v402_v56 = vpop.f32.mrf.mxu0 }
 0x370   :  { %v321_v58 = vpop.f32.mrf.mxu1 }
 0x371   :  { %v330_v59 = vmul.f32 %v427_v57, %v321_v58 }
 0x372   :  { %v407_v60 = vpop.f32.mrf.mxu1 }
 0x373   :  { %332 = vst.msk [vmem:[#allocation2 + $0x8] sm:$0xff] %vm104_vm2, %v330_v59 }
 0x374   :  { %v324_v61 = vpop.f32.mrf.mxu1 }
 0x375   :  { %439 = shalt.err (!%p436_p4)
}
 0x376   :  { %s455_s24 = smov 128   ;;  %s456_s25 = smov 8   ;;  %v408_v62 = vpop.f32.mrf.mxu1 }
 0x377   :  { %344 = dma.vmem_to_hbm [thread:$0]  %s339_s22, 256, %s516_s2, [#allocation3], %s455_s24, %s455_s24, %s456_s25  }
 0x378   :  { %448 = dma.done.wait [#allocation3], 256  }
 0x379   :  { %449 = vsyncadd [#allocation3], 4294967040 }
 0x37a   :  { %348 = vsyncpa [#allocation3], 1 }

</bundles_post_ra>
